<compile_context>
chip_gen: v7x
topology: tpu7x:2x2x1
jax: 0.10.0
libtpu: 0.0.40
codegen_flags: <defaults>
</compile_context>

<pallas_src>
import jax
import jax.numpy as jnp
from jax import lax
from jax.experimental import pallas as pl
from jax.experimental.pallas import tpu as pltpu

# --- model hyperparameters (from the PyTorch module) ------------------------
BLOCK_SIZE = 4
EMBED_SIZE = 1                      # gather/LUT path assumes embed_size == 1
HIDDEN_SIZE = 4
VOCAB_SIZE = 27                     # len(vocab) + 1  (synthetic: 26 chars + 1)
OUTPUT_SIZE = VOCAB_SIZE
IN_FEATURES = EMBED_SIZE * BLOCK_SIZE

# --- lane/sublane padded sizes & packed-parameter-slab layout ----------------
LANE = 128
VOCAB_PAD = LANE                    # 27  -> 128 (lane-dense one-hot / LUT rows)
HIDDEN_PAD = LANE                   # 4   -> 128
OUT_PAD = LANE                      # 27  -> 128 (lane-dense output store)

# slab row offsets (all multiples of 8 sublanes)
ROW_LUT = 0                                   # rows [0, 512):   4 x (128,128) fc1 LUTs
ROW_B1 = ROW_LUT + BLOCK_SIZE * VOCAB_PAD     # 512:             fc1 bias (1 row used)
ROW_W2 = ROW_B1 + 8                           # 520..647:        fc2 weight^T (128 rows)
ROW_B2 = ROW_W2 + HIDDEN_PAD                  # 648:             fc2 bias (1 row used)
TOTAL_ROWS = ROW_B2 + 8                       # 656 rows x 128 lanes x f32 = 328 KiB


# --- shared kernel core: gather -> fc1 -> relu -> fc2 (all padded/lane-dense) -
def _compute_logits(idx_ref, params_ref):
    B = idx_ref.shape[0]
    idx = idx_ref[...]                                               # (B, BLOCK)
    lane_v = lax.broadcasted_iota(jnp.int32, (B, VOCAB_PAD), 1)

    # Fused embedding gather + fc1 on the MXU:
    #   acc[b,h] = sum_k one_hot(idx[b,k]) @ lut_k,  lut_k[v,h] = embed[v]*W1[h,k]
    acc = jnp.zeros((B, HIDDEN_PAD), jnp.float32)
    for k in range(BLOCK_SIZE):                                      # static unroll (K = 4)
        one_hot = (idx[:, k:k + 1] == lane_v).astype(jnp.float32)    # (B, VOCAB_PAD)
        lut_k = params_ref[k * VOCAB_PAD:(k + 1) * VOCAB_PAD, :]     # (VOCAB_PAD, HIDDEN_PAD)
        acc = acc + jnp.dot(one_hot, lut_k, preferred_element_type=jnp.float32)

    b1 = params_ref[ROW_B1:ROW_B1 + 1, :]                            # (1, HIDDEN_PAD)
    h = jnp.maximum(acc + b1, 0.0)                                   # ReLU
    # TODO(synk): torch's `print('Post Relu FC1', x)` host-side tensor dump has
    # no clean Pallas equivalent; omitted.

    w2 = params_ref[ROW_W2:ROW_W2 + HIDDEN_PAD, :]                   # (HIDDEN_PAD, OUT_PAD)
    b2 = params_ref[ROW_B2:ROW_B2 + 1, :]                            # (1, OUT_PAD)
    logits = jnp.dot(h, w2, preferred_element_type=jnp.float32) + b2
    return logits                                                    # (B, OUT_PAD)


def mlp_logits_kernel(idx_ref, params_ref, o_ref):
    o_ref[...] = _compute_logits(idx_ref, params_ref).astype(o_ref.dtype)


def mlp_loss_kernel(idx_ref, tgt_ref, params_ref, o_ref, loss_ref):
    B = idx_ref.shape[0]
    logits = _compute_logits(idx_ref, params_ref)
    o_ref[...] = logits.astype(o_ref.dtype)

    # Fused cross-entropy (padded lanes >= OUTPUT_SIZE are exactly 0 -> mask to -inf).
    lane_o = lax.broadcasted_iota(jnp.int32, (B, OUT_PAD), 1)
    masked = jnp.where(lane_o < OUTPUT_SIZE, logits, -1e30)
    m = jnp.max(masked, axis=-1, keepdims=True)                      # (B, 1)
    s = jnp.sum(jnp.exp(masked - m), axis=-1, keepdims=True)         # (B, 1)
    logz = m + jnp.log(s)
    tgt_onehot = (tgt_ref[...] == lane_o).astype(jnp.float32)        # (B, OUT_PAD)
    tgt_logit = jnp.sum(tgt_onehot * logits, axis=-1, keepdims=True) # (B, 1)
    nll = logz - tgt_logit                                           # (B, 1)
    loss_ref[...] = jnp.mean(nll, axis=0, keepdims=True)             # (1, 1)


# --- wrappers (gridless pallas_call, everything resident in VMEM) ------------
_VMEM = pl.BlockSpec(memory_space=pltpu.MemorySpace.VMEM)


def mlp_pallas_logits(x_idx, slab):
    B = x_idx.shape[0]
    out_pad = pl.pallas_call(
        mlp_logits_kernel,
        out_shape=jax.ShapeDtypeStruct((B, OUT_PAD), jnp.float32),
        in_specs=[_VMEM, _VMEM],
        out_specs=_VMEM,
    )(x_idx, slab)
    return out_pad[:, :OUTPUT_SIZE]


def mlp_pallas_loss(x_idx, targets, slab):
    B = x_idx.shape[0]
    out_pad, loss = pl.pallas_call(
        mlp_loss_kernel,
        out_shape=(jax.ShapeDtypeStruct((B, OUT_PAD), jnp.float32),
                   jax.ShapeDtypeStruct((1, 1), jnp.float32)),
        in_specs=[_VMEM, _VMEM, _VMEM],
        out_specs=(_VMEM, _VMEM),
    )(x_idx, targets.reshape(B, 1), slab)
    return out_pad[:, :OUTPUT_SIZE], loss[0, 0]


# --- one-time parameter layout prep: pack everything into one (656,128) slab -
def prepare_params(params):
    embed_col = params["embed"][:, 0]                                # (VOCAB_SIZE,)
    slab = jnp.zeros((TOTAL_ROWS, LANE), jnp.float32)
    for k in range(BLOCK_SIZE):
        # lut_k[v, h] = embed[v] * W1[h, k]
        lut_k = embed_col[:, None] * params["w1"][:, k][None, :]     # (VOCAB_SIZE, HIDDEN_SIZE)
        slab = slab.at[ROW_LUT + k * VOCAB_PAD:
                       ROW_LUT + k * VOCAB_PAD + VOCAB_SIZE, :HIDDEN_SIZE].set(lut_k)
    slab = slab.at[ROW_B1, :HIDDEN_SIZE].set(params["b1"])
    slab = slab.at[ROW_W2:ROW_W2 + HIDDEN_SIZE, :OUTPUT_SIZE].set(params["w2"].T)
    slab = slab.at[ROW_B2, :OUTPUT_SIZE].set(params["b2"])
    return slab


# --- full forward (kernel does gather + MLP + optional fused CE loss) ---------
def mlp_forward(slab, x_idx, targets=None):
    if targets is None:
        logits = mlp_pallas_logits(x_idx.astype(jnp.int32), slab)
        return logits, None
    logits, loss = mlp_pallas_loss(x_idx.astype(jnp.int32),
                                   targets.astype(jnp.int32), slab)
    return logits, loss


# --- deterministic parameter init (PyTorch-like) ------------------------------
def init_params(key):
    k_e, k_w1, k_b1, k_w2, k_b2 = jax.random.split(key, 5)
    embed = jax.random.normal(k_e, (VOCAB_SIZE, EMBED_SIZE), jnp.float32)
    bound1 = 1.0 / jnp.sqrt(IN_FEATURES)
    w1 = jax.random.uniform(k_w1, (HIDDEN_SIZE, IN_FEATURES), jnp.float32,
                            -bound1, bound1)
    b1 = jax.random.uniform(k_b1, (HIDDEN_SIZE,), jnp.float32, -bound1, bound1)
    bound2 = 1.0 / jnp.sqrt(HIDDEN_SIZE)
    w2 = jax.random.uniform(k_w2, (OUTPUT_SIZE, HIDDEN_SIZE), jnp.float32,
                            -bound2, bound2)
    b2 = jax.random.uniform(k_b2, (OUTPUT_SIZE,), jnp.float32, -bound2, bound2)
    return {"embed": embed, "w1": w1, "b1": b1, "w2": w2, "b2": b2}


if __name__ == "__main__":
    key = jax.random.PRNGKey(0)
    k_p, k_x, k_t = jax.random.split(key, 3)
    params = init_params(k_p)
    slab = prepare_params(params)            # layout prep happens ONCE, not per call

    B = 8
    x_idx = jax.random.randint(k_x, (B, BLOCK_SIZE), 0, VOCAB_SIZE, jnp.int32)
    targets = jax.random.randint(k_t, (B,), 0, OUTPUT_SIZE, jnp.int32)

    fwd = jax.jit(mlp_forward)

    # targets=None path
    logits, loss = fwd(slab, x_idx)
    logits = jax.block_until_ready(logits)
    assert logits.shape == (B, OUTPUT_SIZE)
    assert loss is None

    # pure-JAX reference (original unpadded params)
    emb = jnp.take(params["embed"], x_idx, axis=0).reshape(B, -1)
    h_ref = jnp.maximum(emb @ params["w1"].T + params["b1"], 0.0)
    ref = h_ref @ params["w2"].T + params["b2"]
    assert jnp.allclose(logits, ref, atol=1e-4, rtol=1e-4)

    # loss path (fused cross-entropy in-kernel)
    logits2, loss2 = fwd(slab, x_idx, targets)
    loss2 = jax.block_until_ready(loss2)
    assert jnp.allclose(logits2, ref, atol=1e-4, rtol=1e-4)
    ref_logz = jax.nn.logsumexp(ref, axis=-1)
    ref_loss = jnp.mean(ref_logz - jnp.take_along_axis(ref, targets[:, None], axis=-1)[:, 0])
    assert jnp.allclose(loss2, ref_loss, atol=1e-4, rtol=1e-4)

    print("KERNEL_OK")
</pallas_src>

<mosaic_0001>
module attributes {stable_mosaic.version = 11 : i64} {
  func.func @mlp_logits_kernel(%arg0: memref<8x4xi32, #tpu.memory_space<vmem>>, %arg1: memref<656x128xf32, #tpu.memory_space<vmem>>, %arg2: memref<8x128xf32, #tpu.memory_space<vmem>>) attributes {dimension_semantics = [], scalar_prefetch = 0 : i64, scratch_operands = 0 : i64, tpu.core_type = #tpu.core_type<tc>} {
    %c0 = arith.constant 0 : index
    %c0_0 = arith.constant 0 : index
    %0 = vector.load %arg0[%c0, %c0_0] : memref<8x4xi32, #tpu.memory_space<vmem>>, vector<8x4xi32>
    %1 = tpu.iota {dimensions = array<i32: 1>} : vector<8x128xi32>
    %cst = arith.constant 0.000000e+00 : f32
    %2 = vector.broadcast %cst : f32 to vector<8x128xf32>
    %3 = vector.extract_strided_slice %0 {offsets = [0, 0], sizes = [8, 1], strides = [1, 1]} : vector<8x4xi32> to vector<8x1xi32>
    %4 = vector.broadcast %3 : vector<8x1xi32> to vector<8x128xi32>
    %5 = arith.cmpi eq, %4, %1 : vector<8x128xi32>
    %6 = arith.extui %5 : vector<8x128xi1> to vector<8x128xi32>
    %7 = arith.sitofp %6 : vector<8x128xi32> to vector<8x128xf32>
    %c0_1 = arith.constant 0 : index
    %c0_2 = arith.constant 0 : index
    %8 = vector.load %arg1[%c0_1, %c0_2] : memref<656x128xf32, #tpu.memory_space<vmem>>, vector<128x128xf32>
    %cst_3 = arith.constant dense<0.000000e+00> : vector<8x128xf32>
    %9 = tpu.matmul %7, %8, %cst_3 {dimension_numbers = #tpu.dot_dimension_numbers<[1], [0], [0], [1], [0, 0, 1, 1], [], []>} : vector<8x128xf32>, vector<128x128xf32>, vector<8x128xf32> -> vector<8x128xf32>
    %10 = arith.addf %2, %9 : vector<8x128xf32>
    %11 = vector.extract_strided_slice %0 {offsets = [0, 1], sizes = [8, 1], strides = [1, 1]} : vector<8x4xi32> to vector<8x1xi32>
    %12 = vector.broadcast %11 : vector<8x1xi32> to vector<8x128xi32>
    %13 = arith.cmpi eq, %12, %1 : vector<8x128xi32>
    %14 = arith.extui %13 : vector<8x128xi1> to vector<8x128xi32>
    %15 = arith.sitofp %14 : vector<8x128xi32> to vector<8x128xf32>
    %c128 = arith.constant 128 : index
    %c0_4 = arith.constant 0 : index
    %16 = vector.load %arg1[%c128, %c0_4] : memref<656x128xf32, #tpu.memory_space<vmem>>, vector<128x128xf32>
    %cst_5 = arith.constant dense<0.000000e+00> : vector<8x128xf32>
    %17 = tpu.matmul %15, %16, %cst_5 {dimension_numbers = #tpu.dot_dimension_numbers<[1], [0], [0], [1], [0, 0, 1, 1], [], []>} : vector<8x128xf32>, vector<128x128xf32>, vector<8x128xf32> -> vector<8x128xf32>
    %18 = arith.addf %10, %17 : vector<8x128xf32>
    %19 = vector.extract_strided_slice %0 {offsets = [0, 2], sizes = [8, 1], strides = [1, 1]} : vector<8x4xi32> to vector<8x1xi32>
    %20 = vector.broadcast %19 : vector<8x1xi32> to vector<8x128xi32>
    %21 = arith.cmpi eq, %20, %1 : vector<8x128xi32>
    %22 = arith.extui %21 : vector<8x128xi1> to vector<8x128xi32>
    %23 = arith.sitofp %22 : vector<8x128xi32> to vector<8x128xf32>
    %c256 = arith.constant 256 : index
    %c0_6 = arith.constant 0 : index
    %24 = vector.load %arg1[%c256, %c0_6] : memref<656x128xf32, #tpu.memory_space<vmem>>, vector<128x128xf32>
    %cst_7 = arith.constant dense<0.000000e+00> : vector<8x128xf32>
    %25 = tpu.matmul %23, %24, %cst_7 {dimension_numbers = #tpu.dot_dimension_numbers<[1], [0], [0], [1], [0, 0, 1, 1], [], []>} : vector<8x128xf32>, vector<128x128xf32>, vector<8x128xf32> -> vector<8x128xf32>
    %26 = arith.addf %18, %25 : vector<8x128xf32>
    %27 = vector.extract_strided_slice %0 {offsets = [0, 3], sizes = [8, 1], strides = [1, 1]} : vector<8x4xi32> to vector<8x1xi32>
    %28 = vector.broadcast %27 : vector<8x1xi32> to vector<8x128xi32>
    %29 = arith.cmpi eq, %28, %1 : vector<8x128xi32>
    %30 = arith.extui %29 : vector<8x128xi1> to vector<8x128xi32>
    %31 = arith.sitofp %30 : vector<8x128xi32> to vector<8x128xf32>
    %c384 = arith.constant 384 : index
    %c0_8 = arith.constant 0 : index
    %32 = vector.load %arg1[%c384, %c0_8] : memref<656x128xf32, #tpu.memory_space<vmem>>, vector<128x128xf32>
    %cst_9 = arith.constant dense<0.000000e+00> : vector<8x128xf32>
    %33 = tpu.matmul %31, %32, %cst_9 {dimension_numbers = #tpu.dot_dimension_numbers<[1], [0], [0], [1], [0, 0, 1, 1], [], []>} : vector<8x128xf32>, vector<128x128xf32>, vector<8x128xf32> -> vector<8x128xf32>
    %34 = arith.addf %26, %33 : vector<8x128xf32>
    %c512 = arith.constant 512 : index
    %c0_10 = arith.constant 0 : index
    %35 = vector.load %arg1[%c512, %c0_10] : memref<656x128xf32, #tpu.memory_space<vmem>>, vector<1x128xf32>
    %36 = vector.broadcast %35 : vector<1x128xf32> to vector<8x128xf32>
    %37 = arith.addf %34, %36 : vector<8x128xf32>
    %cst_11 = arith.constant 0.000000e+00 : f32
    %38 = vector.broadcast %cst_11 : f32 to vector<8x128xf32>
    %39 = arith.maximumf %37, %38 : vector<8x128xf32>
    %c520 = arith.constant 520 : index
    %c0_12 = arith.constant 0 : index
    %40 = vector.load %arg1[%c520, %c0_12] : memref<656x128xf32, #tpu.memory_space<vmem>>, vector<128x128xf32>
    %c648 = arith.constant 648 : index
    %c0_13 = arith.constant 0 : index
    %41 = vector.load %arg1[%c648, %c0_13] : memref<656x128xf32, #tpu.memory_space<vmem>>, vector<1x128xf32>
    %cst_14 = arith.constant dense<0.000000e+00> : vector<8x128xf32>
    %42 = tpu.matmul %39, %40, %cst_14 {dimension_numbers = #tpu.dot_dimension_numbers<[1], [0], [0], [1], [0, 0, 1, 1], [], []>} : vector<8x128xf32>, vector<128x128xf32>, vector<8x128xf32> -> vector<8x128xf32>
    %43 = vector.broadcast %41 : vector<1x128xf32> to vector<8x128xf32>
    %44 = arith.addf %42, %43 : vector<8x128xf32>
    %c0_15 = arith.constant 0 : index
    %c0_16 = arith.constant 0 : index
    %45 = vector.load %arg2[%c0_15, %c0_16] : memref<8x128xf32, #tpu.memory_space<vmem>>, vector<8x128xf32>
    tpu.vector_store %arg2[%c0_15, %c0_16], %44 {strides = array<i32>} : memref<8x128xf32, #tpu.memory_space<vmem>>, vector<8x128xf32>,
    return
  }
}

</mosaic_0001>

<bundles_post_ra>
// kernel: mlp_forward.1
= control target key start
LH: loop header
LB: loop body
LE: loop exit
PB: predicated region body
PF: predicated region fallthrough
CT: control target
= control target key end

     0   :  { %7 = vsyncpa [#allocation3], 0  ;;  %s1082_s0 = inlined_call_operand.vmem [shape: s32[8,4], index: 0, kind: input, shape index: {}]   ;;  %s1083_s1 = inlined_call_operand.hbm [shape: f32[656,128], index: 1, kind: input, shape index: {}]   ;;  %s1084_s2 = inlined_call_operand.hbm [shape: f32[8,128], index: 2, kind: output, shape index: {}]  }
   0x1   :  { %8 = vsyncpa [#allocation4], 0  ;;  %s968_s9 = smov [#allocation2]   ;;  %s920_s13 = scalar_lea.hbm %s1083_s1, 10496 }
   0x2   :  { %s16_s10 = sshll.u32 %s968_s9, 4  ;;  %p921_p0 = scmp.ne.s32.totalorder %s1083_s1, %s920_s13  ;;  %s17_s10 = int_to_ptr.vmem [resolvable:$true] %s16_s10 }
   0x3   :  { %p924_p1 = scmp.lt.u32.totalorder %s920_s13, %s1083_s1 }
   0x5   :  { %p926_p2 = pnand %p924_p1, %p921_p0 }
   0x7   :  { %929 = shalt.err (!%p926_p2)
}
   0x8   :  { %s930_s18 = scalar_lea.vmem %s17_s10, 10496  ;;  %p935_p4 = scmp.lt.s32.totalorder %s17_s10, %s17_s10 }
   0x9   :  { %p931_p3 = scmp.ne.s32.totalorder %s17_s10, %s930_s18  ;;  %p936_p5 = scmp.lt.s32.totalorder %s930_s18, %s930_s18 }
   0xb   :  { %p937_p6 = por %p936_p5, %p935_p4 }
   0xd   :  { %p938_p7 = pnand %p937_p6, %p931_p3 }
   0xf   :  { %941 = shalt.err (!%p938_p7)
}
  0x10   :  { %s969_s19 = smov 128   ;;  %s970_s20 = smov 8  }
  0x11   :  { %22 = dma.hbm_to_vmem [thread:$0]  %s1083_s1, 10496, %s17_s10, [#allocation3], %s969_s19, %s969_s19, %s970_s20  }
  0x12   :  { %964 = dma.done.wait [#allocation3], 10496  }
  0x13   :  { %965 = vsyncadd [#allocation3], 4294956800  ;;  %v971_v0 = vmov 1   ;;  %v972_v1 = vmov 2   ;;  %v973_v2 = vmov 0.0|0.0   ;;  %v26_v3 = vld [vmem:[%s1082_s0] sm:$0xff]  ;;  %v27_v55 = vlaneseq }
  0x14   :  { %915 = vset.pattern.permute.xlu0 %v971_v0  ;;  %917 = vset.pattern.permute.xlu1 %v972_v1  ;;  %v57_v4 = vld [vmem:[#allocation2 + $0x80] sm:$0xff]  ;;  %v58_v5 = vld [vmem:[#allocation2 + $0x88] sm:$0xff]  ;;  %v59_v7 = vld [vmem:[#allocation2 + $0x90] sm:$0xff]  ;;  %vm974_vm0 = vmmov 0   ;;  %v975_v11 = vmov 0.0   ;;  %v976_v18 = vmov 0  }
  0x15   :  { %783 = vmatprep.subr.bf16.mxu0 %v973_v2  ;;  %807 = vmatprep.subr.bf16.mxu1 %v973_v2  ;;  %v784_v6 = vpack.c.bf16 %v58_v5, %v57_v4  ;;  %v60_v8 = vld [vmem:[#allocation2 + $0x98] sm:$0xff]  ;;  %v35_v9 = vld [vmem:[#allocation2] sm:$0xff]  ;;  %v36_v10 = vld [vmem:[#allocation2 + $0x8] sm:$0xff]  ;;  %v977_v19 = vmov 3   ;;  %v1032_v58 = vand.u32 127, %v27_v55  ;;  %v978_v1 = vmov 1.0  }
  0x16   :  { %52 = vperm.xlu0 %915, %v26_v3   ;;  %214 = vperm.xlu1 %917, %v26_v3   ;;  %v787_v12 = vpack.c.bf16 %v60_v8, %v59_v7  ;;  %v808_v13 = vpack.c.bf16 %v36_v10, %v35_v9  ;;  %v61_v14 = vld [vmem:[#allocation2 + $0xa0] sm:$0xff]  ;;  %v62_v15 = vld [vmem:[#allocation2 + $0xa8] sm:$0xff]  ;;  %v37_v16 = vld [vmem:[#allocation2 + $0x10] sm:$0xff]  ;;  %s979_s0 = smov [#allocation5]  }
  0x17   :  { %640 = vmatprep.mubr.msk.f32.mxu0 %vm974_vm0, %v975_v11  ;;  %675 = vmatprep.mubr.msk.f32.mxu1 %vm974_vm0, %v975_v11  ;;  %v38_v17 = vld [vmem:[#allocation2 + $0x18] sm:$0xff]  ;;  %v790_v20 = vpack.c.bf16 %v62_v15, %v61_v14  ;;  %v63_v22 = vld [vmem:[#allocation2 + $0xb0] sm:$0xff]  ;;  %v39_v24 = vld [vmem:[#allocation2 + $0x20] sm:$0xff]  ;;  %s504_s1 = sshll.u32 %s979_s0, 4  ;;  %s505_s1 = int_to_ptr.vmem [resolvable:$true] %s504_s1 }
  0x18   :  { %785 = vmatpush3.bf16.msra.mxu0 %v784_v6  ;;  %809 = vmatpush3.bf16.msra.mxu1 %v808_v13  ;;  %v811_v21 = vpack.c.bf16 %v38_v17, %v37_v16  ;;  %v64_v23 = vld [vmem:[#allocation2 + $0xb8] sm:$0xff]  ;;  %v40_v25 = vld [vmem:[#allocation2 + $0x28] sm:$0xff]  ;;  %v65_v28 = vld [vmem:[#allocation2 + $0xc0] sm:$0xff]  ;;  %s942_s25 = scalar_lea.vmem %s505_s1, 128  ;;  %p947_p9 = scmp.lt.s32.totalorder %s505_s1, %s505_s1 }
  0x19   :  { %786 = vmatprep.subr.bf16.mxu0 %v973_v2  ;;  %810 = vmatprep.subr.bf16.mxu1 %v973_v2  ;;  %v793_v26 = vpack.c.bf16 %v64_v23, %v63_v22  ;;  %v814_v27 = vpack.c.bf16 %v40_v25, %v39_v24  ;;  %v66_v29 = vld [vmem:[#allocation2 + $0xc8] sm:$0xff]  ;;  %v41_v30 = vld [vmem:[#allocation2 + $0x30] sm:$0xff]  ;;  %v42_v31 = vld [vmem:[#allocation2 + $0x38] sm:$0xff]  ;;  %p943_p8 = scmp.ne.s32.totalorder %s505_s1, %s942_s25  ;;  %p948_p10 = scmp.lt.s32.totalorder %s942_s25, %s942_s25 }
  0x1a   :  { %916 = vset.pattern.permute.xlu0 %v976_v18  ;;  %918 = vset.pattern.permute.xlu1 %v977_v19  ;;  %v796_v32 = vpack.c.bf16 %v66_v29, %v65_v28  ;;  %v817_v33 = vpack.c.bf16 %v42_v31, %v41_v30  ;;  %v67_v34 = vld [vmem:[#allocation2 + $0xd0] sm:$0xff]  ;;  %v68_v35 = vld [vmem:[#allocation2 + $0xd8] sm:$0xff]  ;;  %v43_v36 = vld [vmem:[#allocation2 + $0x40] sm:$0xff] }
  0x1b   :  { %30 = vperm.xlu0 %916, %v26_v3   ;;  %307 = vperm.xlu1 %918, %v26_v3   ;;  %v44_v37 = vld [vmem:[#allocation2 + $0x48] sm:$0xff]  ;;  %v799_v38 = vpack.c.bf16 %v68_v35, %v67_v34  ;;  %v69_v40 = vld [vmem:[#allocation2 + $0xe0] sm:$0xff]  ;;  %v45_v42 = vld [vmem:[#allocation2 + $0x50] sm:$0xff]  ;;  %p949_p11 = por %p948_p10, %p947_p9 }
  0x1c   :  { %788 = vmatpush3.bf16.msra.mxu0 %v787_v12  ;;  %812 = vmatpush3.bf16.msra.mxu1 %v811_v21  ;;  %v820_v39 = vpack.c.bf16 %v44_v37, %v43_v36  ;;  %v70_v41 = vld [vmem:[#allocation2 + $0xe8] sm:$0xff]  ;;  %v46_v43 = vld [vmem:[#allocation2 + $0x58] sm:$0xff]  ;;  %v71_v46 = vld [vmem:[#allocation2 + $0xf0] sm:$0xff] }
  0x1d   :  { %789 = vmatprep.subr.bf16.mxu0 %v973_v2  ;;  %813 = vmatprep.subr.bf16.mxu1 %v973_v2  ;;  %v802_v44 = vpack.c.bf16 %v70_v41, %v69_v40  ;;  %v823_v45 = vpack.c.bf16 %v46_v43, %v45_v42  ;;  %v72_v47 = vld [vmem:[#allocation2 + $0xf8] sm:$0xff]  ;;  %v47_v48 = vld [vmem:[#allocation2 + $0x60] sm:$0xff]  ;;  %v48_v49 = vld [vmem:[#allocation2 + $0x68] sm:$0xff]  ;;  %p950_p12 = pnand %p949_p11, %p943_p8 }
  0x1e   :  { %v805_v50 = vpack.c.bf16 %v72_v47, %v71_v46  ;;  %v826_v51 = vpack.c.bf16 %v48_v49, %v47_v48  ;;  %v49_v52 = vld [vmem:[#allocation2 + $0x70] sm:$0xff]  ;;  %v50_v53 = vld [vmem:[#allocation2 + $0x78] sm:$0xff]  ;;  %v219_v56 = vld [vmem:[#allocation2 + $0x100] sm:$0xff] }
  0x1f   :  { %919 = vset.pattern.permute.xlu0 %v977_v19  ;;  %v829_v54 = vpack.c.bf16 %v50_v53, %v49_v52  ;;  %v220_v57 = vld [vmem:[#allocation2 + $0x108] sm:$0xff]  ;;  %v221_v61 = vld [vmem:[#allocation2 + $0x110] sm:$0xff]  ;;  %v222_v62 = vld [vmem:[#allocation2 + $0x118] sm:$0xff] }
  0x20   :  { %791 = vmatpush3.bf16.msra.mxu0 %v790_v20  ;;  %815 = vmatpush3.bf16.msra.mxu1 %v814_v27  ;;  %v832_v59 = vpack.c.bf16 %v220_v57, %v219_v56  ;;  %v312_v63 = vld [vmem:[#allocation2 + $0x180] sm:$0xff]  ;;  %v313_v0 = vld [vmem:[#allocation2 + $0x188] sm:$0xff]  ;;  %v835_v3 = vpack.c.bf16 %v222_v62, %v221_v61  ;;  %v314_v8 = vld [vmem:[#allocation2 + $0x190] sm:$0xff] }
  0x21   :  { %792 = vmatprep.subr.bf16.mxu0 %v973_v2  ;;  %816 = vmatprep.subr.bf16.mxu1 %v973_v2  ;;  %v856_v4 = vpack.c.bf16 %v313_v0, %v312_v63  ;;  %v223_v5 = vld [vmem:[#allocation2 + $0x120] sm:$0xff]  ;;  %v224_v6 = vld [vmem:[#allocation2 + $0x128] sm:$0xff]  ;;  %v315_v9 = vld [vmem:[#allocation2 + $0x198] sm:$0xff] }
  0x22   :  { %v838_v10 = vpack.c.bf16 %v224_v6, %v223_v5  ;;  %v859_v12 = vpack.c.bf16 %v315_v9, %v314_v8  ;;  %v225_v13 = vld [vmem:[#allocation2 + $0x130] sm:$0xff]  ;;  %v226_v14 = vld [vmem:[#allocation2 + $0x138] sm:$0xff]  ;;  %v316_v15 = vld [vmem:[#allocation2 + $0x1a0] sm:$0xff] }
  0x23   :  { %v317_v16 = vld [vmem:[#allocation2 + $0x1a8] sm:$0xff]  ;;  %v841_v17 = vpack.c.bf16 %v226_v14, %v225_v13  ;;  %v227_v19 = vld [vmem:[#allocation2 + $0x140] sm:$0xff]  ;;  %v318_v21 = vld [vmem:[#allocation2 + $0x1b0] sm:$0xff] }
  0x24   :  { %794 = vmatpush3.bf16.msra.mxu0 %v793_v26  ;;  %818 = vmatpush3.bf16.msra.mxu1 %v817_v33  ;;  %v862_v18 = vpack.c.bf16 %v317_v16, %v316_v15  ;;  %v228_v20 = vld [vmem:[#allocation2 + $0x148] sm:$0xff]  ;;  %v319_v22 = vld [vmem:[#allocation2 + $0x1b8] sm:$0xff]  ;;  %v229_v25 = vld [vmem:[#allocation2 + $0x150] sm:$0xff] }
  0x25   :  { %795 = vmatprep.subr.bf16.mxu0 %v973_v2  ;;  %819 = vmatprep.subr.bf16.mxu1 %v973_v2  ;;  %v844_v23 = vpack.c.bf16 %v228_v20, %v227_v19  ;;  %v865_v24 = vpack.c.bf16 %v319_v22, %v318_v21  ;;  %v230_v26 = vld [vmem:[#allocation2 + $0x158] sm:$0xff]  ;;  %v320_v27 = vld [vmem:[#allocation2 + $0x1c0] sm:$0xff]  ;;  %v321_v28 = vld [vmem:[#allocation2 + $0x1c8] sm:$0xff] }
  0x26   :  { %v847_v29 = vpack.c.bf16 %v230_v26, %v229_v25  ;;  %v868_v30 = vpack.c.bf16 %v321_v28, %v320_v27  ;;  %v231_v31 = vld [vmem:[#allocation2 + $0x160] sm:$0xff]  ;;  %v322_v33 = vld [vmem:[#allocation2 + $0x1d0] sm:$0xff]  ;;  %v323_v34 = vld [vmem:[#allocation2 + $0x1d8] sm:$0xff] }
  0x27   :  { %v871_v36 = vpack.c.bf16 %v323_v34, %v322_v33  ;;  %v233_v37 = vld [vmem:[#allocation2 + $0x170] sm:$0xff]  ;;  %v325_v40 = vld [vmem:[#allocation2 + $0x1e8] sm:$0xff]  ;;  %v409_v52 = vld [vmem:[#allocation2 + $0x220] sm:$0xff] }
  0x28   :  { %797 = vmatpush3.bf16.msra.mxu0 %v796_v32  ;;  %821 = vmatpush3.bf16.msra.mxu1 %v820_v39  ;;  %v232_v32 = vld [vmem:[#allocation2 + $0x168] sm:$0xff]  ;;  %v324_v39 = vld [vmem:[#allocation2 + $0x1e0] sm:$0xff]  ;;  %v407_v49 = vld [vmem:[#allocation2 + $0x210] sm:$0xff] }
  0x29   :  { %798 = vmatprep.subr.bf16.mxu0 %v973_v2  ;;  %822 = vmatprep.subr.bf16.mxu1 %v973_v2  ;;  %v850_v35 = vpack.c.bf16 %v232_v32, %v231_v31  ;;  %v874_v43 = vpack.c.bf16 %v325_v40, %v324_v39  ;;  %v406_v48 = vld [vmem:[#allocation2 + $0x208] sm:$0xff]  ;;  %v411_v55 = vld [vmem:[#allocation2 + $0x230] sm:$0xff]  ;;  %v413_v57 = vld [vmem:[#allocation2 + $0x240] sm:$0xff] }
  0x2a   :  { %v416_v62 = vld [vmem:[#allocation2 + $0x258] sm:$0xff]  ;;  %v417_v63 = vld [vmem:[#allocation2 + $0x260] sm:$0xff] }
  0x2b   :  { %v895_v0 = vpack.c.bf16 %v417_v63, %v416_v62  ;;  %v420_v5 = vld [vmem:[#allocation2 + $0x278] sm:$0xff]  ;;  %v421_v6 = vld [vmem:[#allocation2 + $0x280] sm:$0xff] }
  0x2c   :  { %800 = vmatpush3.bf16.msra.mxu0 %v799_v38  ;;  %824 = vmatpush3.bf16.msra.mxu1 %v823_v45  ;;  %v234_v38 = vld [vmem:[#allocation2 + $0x178] sm:$0xff] }
  0x2d   :  { %801 = vmatprep.subr.bf16.mxu0 %v973_v2  ;;  %825 = vmatprep.subr.bf16.mxu1 %v973_v2  ;;  %v853_v41 = vpack.c.bf16 %v234_v38, %v233_v37  ;;  %v327_v45 = vld [vmem:[#allocation2 + $0x1f8] sm:$0xff] }
  0x30   :  { %803 = vmatpush3.bf16.msra.mxu0 %v802_v44  ;;  %827 = vmatpush3.bf16.msra.mxu1 %v826_v51  ;;  %v326_v44 = vld [vmem:[#allocation2 + $0x1f0] sm:$0xff]  ;;  %v880_v51 = vpack.c.bf16 %v407_v49, %v406_v48 }
  0x31   :  { %804 = vmatprep.subr.bf16.mxu0 %v973_v2  ;;  %828 = vmatprep.subr.bf16.mxu1 %v973_v2  ;;  %v877_v46 = vpack.c.bf16 %v327_v45, %v326_v44 }
  0x34   :  { %806 = vmatpush3.bf16.msra.mxu0 %v805_v50  ;;  %830 = vmatpush3.bf16.msra.mxu1 %v829_v54  ;;  %v408_v50 = vld [vmem:[#allocation2 + $0x218] sm:$0xff]  ;;  %v410_v54 = vld [vmem:[#allocation2 + $0x228] sm:$0xff] }
  0x35   :  { %831 = vmatprep.subr.bf16.mxu0 %v973_v2  ;;  %855 = vmatprep.subr.bf16.mxu1 %v973_v2  ;;  %v883_v53 = vpack.c.bf16 %v409_v52, %v408_v50  ;;  %v886_v56 = vpack.c.bf16 %v411_v55, %v410_v54 }
  0x95   :  { %v53_v60 = vpop.permute.xlu0 %52  ;;  %v215_v42 = vpop.permute.xlu1 %214 }
  0x96   :  { %vm54_vm1 = vcmp.eq.s32.totalorder %v53_v60, %v1032_v58  ;;  %vm216_vm3 = vcmp.eq.s32.totalorder %v215_v42, %v1032_v58  ;;  %v415_v60 = vld [vmem:[#allocation2 + $0x250] sm:$0xff] }
  0x97   :  { %641 = vmatmul.mubr.msk.f32.vlgmr.msra.gmra.mrb[0].mxu0 %vm54_vm1, %v978_v1 }
  0x98   :  { %833 = vmatpush3.bf16.msra.mxu0 %v832_v59  ;;  %710 = vmatprep.mubr.msk.f32.mxu0 %vm974_vm0, %v975_v11  ;;  %v414_v59 = vld [vmem:[#allocation2 + $0x248] sm:$0xff] }
  0x99   :  { %834 = vmatprep.subr.bf16.mxu0 %v973_v2  ;;  %v892_v61 = vpack.c.bf16 %v415_v60, %v414_v59 }
  0x9a   :  { %v31_v7 = vpop.permute.xlu0 %30  ;;  %v308_v47 = vpop.permute.xlu1 %307 }
  0x9b   :  { %vm32_vm2 = vcmp.eq.s32.totalorder %v31_v7, %v1032_v58  ;;  %vm309_vm4 = vcmp.eq.s32.totalorder %v308_v47, %v1032_v58  ;;  %v901_v7 = vpack.c.bf16 %v421_v6, %v420_v5 }
  0x9c   :  { %836 = vmatpush3.bf16.msra.mxu0 %v835_v3  ;;  %676 = vmatmul.mubr.msk.f32.vlgmr.msra.gmra.mrb[0].mxu1 %vm32_vm2, %v978_v1  ;;  %v419_v3 = vld [vmem:[#allocation2 + $0x270] sm:$0xff] }
  0x9d   :  { %857 = vmatpush3.bf16.msra.mxu1 %v856_v4  ;;  %837 = vmatprep.subr.bf16.mxu0 %v973_v2 }
  0x9e   :  { %858 = vmatprep.subr.bf16.mxu1 %v973_v2  ;;  %745 = vmatprep.mubr.msk.f32.mxu1 %vm974_vm0, %v975_v11 }
  0xa0   :  { %839 = vmatpush3.bf16.msra.mxu0 %v838_v10 }
  0xa1   :  { %860 = vmatpush3.bf16.msra.mxu1 %v859_v12  ;;  %840 = vmatprep.subr.bf16.mxu0 %v973_v2 }
  0xa2   :  { %861 = vmatprep.subr.bf16.mxu1 %v973_v2 }
  0xa4   :  { %842 = vmatpush3.bf16.msra.mxu0 %v841_v17 }
  0xa5   :  { %863 = vmatpush3.bf16.msra.mxu1 %v862_v18  ;;  %843 = vmatprep.subr.bf16.mxu0 %v973_v2  ;;  %v521_v18 = vld [vmem:[#allocation2 + $0x200] ss:$0 sm:$0xff] }
  0xa6   :  { %864 = vmatprep.subr.bf16.mxu1 %v973_v2 }
  0xa8   :  { %845 = vmatpush3.bf16.msra.mxu0 %v844_v23 }
  0xa9   :  { %866 = vmatpush3.bf16.msra.mxu1 %v865_v24  ;;  %846 = vmatprep.subr.bf16.mxu0 %v973_v2 }
  0xaa   :  { %867 = vmatprep.subr.bf16.mxu1 %v973_v2 }
  0xac   :  { %848 = vmatpush3.bf16.msra.mxu0 %v847_v29 }
  0xad   :  { %869 = vmatpush3.bf16.msra.mxu1 %v868_v30  ;;  %849 = vmatprep.subr.bf16.mxu0 %v973_v2 }
  0xae   :  { %870 = vmatprep.subr.bf16.mxu1 %v973_v2 }
  0xb0   :  { %851 = vmatpush3.bf16.msra.mxu0 %v850_v35 }
  0xb1   :  { %872 = vmatpush3.bf16.msra.mxu1 %v871_v36  ;;  %852 = vmatprep.subr.bf16.mxu0 %v973_v2 }
  0xb2   :  { %873 = vmatprep.subr.bf16.mxu1 %v973_v2 }
  0xb4   :  { %854 = vmatpush3.bf16.msra.mxu0 %v853_v41 }
  0xb5   :  { %875 = vmatpush3.bf16.msra.mxu1 %v874_v43  ;;  %879 = vmatprep.subr.bf16.mxu0 %v973_v2 }
  0xb6   :  { %876 = vmatprep.subr.bf16.mxu1 %v973_v2 }
  0xb7   :  { %711 = vmatmul.mubr.msk.f32.vlgmr.msra.gmra.mrb[2].mxu0 %vm216_vm3, %v978_v1 }
  0xb8   :  { %780 = vmatprep.mubr.msk.f32.mxu0 %vm974_vm0, %v975_v11  ;;  %881 = vmatpush3.bf16.msra.mxu0 %v880_v51  ;;  %v412_v11 = vld [vmem:[#allocation2 + $0x238] sm:$0xff] }
  0xb9   :  { %878 = vmatpush3.bf16.msra.mxu1 %v877_v46  ;;  %882 = vmatprep.subr.bf16.mxu0 %v973_v2  ;;  %v889_v58 = vpack.c.bf16 %v413_v57, %v412_v11 }
  0xbc   :  { %746 = vmatmul.mubr.msk.f32.vlgmr.msra.gmra.mrb[2].mxu1 %vm309_vm4, %v978_v1  ;;  %884 = vmatpush3.bf16.msra.mxu0 %v883_v53  ;;  %v418_v1 = vld [vmem:[#allocation2 + $0x268] sm:$0xff] }
  0xbd   :  { %885 = vmatprep.subr.bf16.mxu0 %v973_v2  ;;  %v898_v4 = vpack.c.bf16 %v419_v3, %v418_v1 }
  0xc0   :  { %887 = vmatpush3.bf16.msra.mxu0 %v886_v56 }
  0xc1   :  { %888 = vmatprep.subr.bf16.mxu0 %v973_v2 }
  0xc4   :  { %890 = vmatpush3.bf16.msra.mxu0 %v889_v58 }
  0xc5   :  { %891 = vmatprep.subr.bf16.mxu0 %v973_v2 }
  0xc8   :  { %893 = vmatpush3.bf16.msra.mxu0 %v892_v61 }
  0xc9   :  { %894 = vmatprep.subr.bf16.mxu0 %v973_v2 }
  0xcc   :  { %896 = vmatpush3.bf16.msra.mxu0 %v895_v0 }
  0xcd   :  { %897 = vmatprep.subr.bf16.mxu0 %v973_v2 }
  0xd0   :  { %899 = vmatpush3.bf16.msra.mxu0 %v898_v4 }
  0xd1   :  { %900 = vmatprep.subr.bf16.mxu0 %v973_v2  ;;  %v522_v2 = vld [vmem:[#allocation2 + $0x288] ss:$0 sm:$0xff] }
  0xd4   :  { %902 = vmatpush3.bf16.msra.mxu0 %v901_v7 }
 0x16a   :  { %v139_v8 = vpop.f32.mrb[0].mxu0 }
 0x16b   :  { %v642_v9 = vpop.f32.mrb[1].mxu0 }
 0x16f   :  { %v209_v10 = vpop.f32.mrb[0].mxu1 }
 0x170   :  { %v210_v12 = vadd.f32 %v209_v10, %v139_v8  ;;  %v677_v13 = vpop.f32.mrb[1].mxu1 }
 0x18a   :  { %v301_v14 = vpop.f32.mrb[2].mxu0 }
 0x18b   :  { %v305_v15 = vadd.f32 %v301_v14, %v210_v12  ;;  %v712_v16 = vpop.f32.mrb[3].mxu0 }
 0x18f   :  { %v394_v17 = vpop.f32.mrb[2].mxu1 }
 0x190   :  { %v398_v19 = vadd.f32 %v394_v17, %v305_v15  ;;  %v747_v20 = vpop.f32.mrb[3].mxu1 }
 0x192   :  { %v404_v21 = vadd.f32 %v521_v18, %v398_v19 }
 0x194   :  { %v405_v22 = vmax.f32 %v404_v21, 0.0 }
 0x196   :  { %781 = vmatmul.mubr.f32.vlgmr.msra.gmra.mrb[4].mxu0 %v405_v22 }
 0x269   :  { %v493_v23 = vpop.f32.mrb[4].mxu0 }
 0x26a   :  { %v494_v24 = vadd.f32 %v522_v2, %v493_v23  ;;  %v782_v25 = vpop.f32.mrb[5].mxu0 }
 0x26c   :  { %497 = vst [vmem:[#allocation5] sm:$0xff] %v494_v24 }
 0x26d   :  { %953 = shalt.err (!%p950_p12)
}
 0x26e   :  { %s954_s28 = scalar_lea.hbm %s1084_s2, 128 }
 0x26f   :  { %p955_p13 = scmp.ne.s32.totalorder %s1084_s2, %s954_s28  ;;  %p958_p0 = scmp.lt.u32.totalorder %s954_s28, %s1084_s2 }
 0x271   :  { %p960_p1 = pnand %p958_p0, %p955_p13 }
 0x273   :  { %963 = shalt.err (!%p960_p1)
}
 0x274   :  { %507 = dma.vmem_to_hbm [thread:$0]  %s505_s1, 128, %s1084_s2, [#allocation4]  }
 0x275   :  { %966 = dma.done.wait [#allocation4], 128  }
 0x276   :  { %967 = vsyncadd [#allocation4], 4294967168 }
 0x277   :  { %511 = vsyncpa [#allocation3], 1 }
 0x278   :  { %512 = vsyncpa [#allocation4], 1 }

</bundles_post_ra>
